<compile_context>
chip_gen: v7x
topology: tpu7x:2x2x1
jax: 0.10.0
libtpu: 0.0.40
codegen_flags: <defaults>
</compile_context>

<pallas_src>
import math

import numpy as np
import jax
import jax.numpy as jnp
from jax.experimental import pallas as pl
from jax.experimental.pallas import tpu as pltpu

_PI = 3.14159265358979323846


def _atan2(y, x):
    """Element-wise atan2(y, x) (torch.angle convention) from basic VPU ops."""
    abs_y = jnp.abs(y)
    abs_x = jnp.abs(x)
    mx = jnp.maximum(abs_x, abs_y)
    mn = jnp.minimum(abs_x, abs_y)
    # divisions as multiplies by approx reciprocal -> EUP slot, off the VALU
    z = mn * pl.reciprocal(jnp.maximum(mx, jnp.float32(1e-30)), approx=True)
    # extra range reduction at tan(pi/8), then odd polynomial (Cephes atanf)
    big = z > jnp.float32(0.4142135623730950)
    t = jnp.where(big, (z - 1.0) * pl.reciprocal(z + 1.0, approx=True), z)
    base = jnp.where(big, jnp.float32(_PI / 4), jnp.float32(0.0))
    t2 = t * t
    p = jnp.float32(8.05374449538e-2)
    p = p * t2 - jnp.float32(1.38776856032e-1)
    p = p * t2 + jnp.float32(1.99777106478e-1)
    p = p * t2 - jnp.float32(3.33329491539e-1)
    r = base + p * t2 * t + t
    r = jnp.where(abs_y > abs_x, jnp.float32(_PI / 2) - r, r)
    r = jnp.where(x < 0, jnp.float32(_PI) - r, r)
    r = jnp.where(y < 0, -r, r)
    return r


def _dft_matrices(H, W, Wf_pad, tb, dtype):
    """Full-DFT-over-H matrix and block-diagonal half-spectrum-rDFT-over-W."""
    Wf = W // 2 + 1
    kh = np.arange(H)[:, None] * np.arange(H)[None, :]
    ah = -2.0 * np.pi * kh / H                                    # (H, H)
    kw = np.arange(W)[:, None] * np.arange(Wf)[None, :]
    aw = -2.0 * np.pi * kw / W                                    # (W, Wf)
    fw_r = np.zeros((W, Wf_pad), np.float32)
    fw_i = np.zeros((W, Wf_pad), np.float32)
    fw_r[:, :Wf] = np.cos(aw)                                     # padded cols = 0
    fw_i[:, :Wf] = np.sin(aw)
    eye = np.eye(tb, dtype=np.float32)
    fb_r = np.kron(eye, fw_r)                                     # (tb*W, tb*Wf_pad)
    fb_i = np.kron(eye, fw_i)
    return (jnp.asarray(np.cos(ah), dtype), jnp.asarray(np.sin(ah), dtype),
            jnp.asarray(fb_r, dtype), jnp.asarray(fb_i, dtype))


def pha_loss(x, y, *, tile_images=None, compute_dtype=jnp.bfloat16):
    """Pallas implementation of PhaLoss.forward(x, y) -> scalar f32."""
    B, C, H, W = x.shape
    BC = B * C
    Wf = W // 2 + 1
    Wf_pad = ((Wf + 7) // 8) * 8              # zero-padded freq columns -> |diff| == 0

    # ---- how many images ride in one grid step (lane-dense tiles) ----------
    # Note: the block-diagonal F_w trick targets modest W (tb*W ~ 128..512);
    # for the module's typical image sizes this is exactly 128 wide.
    if tile_images is None:
        tile_images = 128 // math.gcd(W, 128)   # smallest tb with tb*W % 128 == 0
    tb = max(1, int(tile_images))
    if (tb * W) % 128 != 0:
        tb = BC                                 # single full-extent block is always legal
    bc_pad = -(-BC // tb) * tb                  # zero-image padding (contributes 0)
    num_blocks = bc_pad // tb

    # ---- wrapper-side layout plumbing: (B,C,H,W) -> (H, bc_pad*W) ----------
    def prep(a):
        a = a.reshape(BC, H, W).astype(jnp.float32)
        if bc_pad != BC:
            a = jnp.concatenate(
                [a, jnp.zeros((bc_pad - BC, H, W), jnp.float32)], axis=0)
        a = jnp.transpose(a, (1, 0, 2)).reshape(H, bc_pad * W)
        return a.astype(compute_dtype)

    xf = prep(x)
    yf = prep(y)
    fh_r, fh_i, fb_r, fb_i = _dft_matrices(H, W, Wf_pad, tb, compute_dtype)
    inv_n = 1.0 / float(BC * H * Wf)            # L1Loss 'mean' over true elements

    def kernel(x_ref, y_ref, fhr_ref, fhi_ref, fbr_ref, fbi_ref, o_ref, acc_ref):
        i = pl.program_id(0)

        @pl.when(i == 0)
        def _init():
            o_ref[...] = jnp.zeros_like(o_ref)
            acc_ref[...] = jnp.zeros_like(acc_ref)

        fhr = fhr_ref[...]
        fhi = fhi_ref[...]
        fbr = fbr_ref[...]
        fbi = fbi_ref[...]

        def phase(img):                          # img: (H, tb*W), real
            # (1) full complex DFT over H: lane-dense N = tb*W
            ar = jnp.dot(fhr, img, preferred_element_type=jnp.float32)
            ai = jnp.dot(fhi, img, preferred_element_type=jnp.float32)
            ar = ar.astype(fbr.dtype)
            ai = ai.astype(fbr.dtype)
            # (2) half-spectrum rDFT over W via kron(I_tb, F_w): corner turn is
            #     fused into the contraction -> no in-kernel transpose/reshape,
            #     output already lane-dense as (H, tb*Wf_pad).
            xr = (jnp.dot(ar, fbr, preferred_element_type=jnp.float32)
                  - jnp.dot(ai, fbi, preferred_element_type=jnp.float32))
            xi = (jnp.dot(ar, fbi, preferred_element_type=jnp.float32)
                  + jnp.dot(ai, fbr, preferred_element_type=jnp.float32))
            return _atan2(xi, xr)                # torch.angle

        px = phase(x_ref[...])
        py = phase(y_ref[...])
        acc_ref[...] = acc_ref[...] + jnp.abs(px - py)   # elementwise, no XLU reduce

        @pl.when(i == pl.num_programs(0) - 1)
        def _finalize():
            # single cross-lane reduction + mean scaling for the whole tensor
            o_ref[...] = o_ref[...] + jnp.sum(acc_ref[...]) * jnp.float32(inv_n)

    out = pl.pallas_call(
        kernel,
        out_shape=jax.ShapeDtypeStruct((1, 1), jnp.float32),
        grid_spec=pltpu.PrefetchScalarGridSpec(
            num_scalar_prefetch=0,
            grid=(num_blocks,),
            in_specs=[
                pl.BlockSpec((H, tb * W), lambda i: (0, i)),           # x tile
                pl.BlockSpec((H, tb * W), lambda i: (0, i)),           # y tile
                pl.BlockSpec((H, H), lambda i: (0, 0)),                # F_h real (const)
                pl.BlockSpec((H, H), lambda i: (0, 0)),                # F_h imag (const)
                pl.BlockSpec((tb * W, tb * Wf_pad), lambda i: (0, 0)), # F_w real blockdiag
                pl.BlockSpec((tb * W, tb * Wf_pad), lambda i: (0, 0)), # F_w imag blockdiag
            ],
            out_specs=pl.BlockSpec((1, 1), lambda i: (0, 0)),          # scalar loss
            scratch_shapes=[pltpu.VMEM((H, tb * Wf_pad), jnp.float32)],
        ),
        compiler_params=pltpu.CompilerParams(
            # The grid axis carries the running VMEM accumulator -> "arbitrary".
            # (On v7x, per-block partial outputs + "parallel" would engage both
            #  TensorCores; unnecessary at these sizes.)
            dimension_semantics=("arbitrary",),
            vmem_limit_bytes=32 * 1024 * 1024,
        ),
    )(xf, yf, fh_r, fh_i, fb_r, fb_i)
    return out[0, 0]


def pha_loss_ref(x, y):
    xa = jnp.angle(jnp.fft.rfft2(x))
    ya = jnp.angle(jnp.fft.rfft2(y))
    return jnp.mean(jnp.abs(xa - ya))


if __name__ == "__main__":
    key = jax.random.PRNGKey(0)
    k1, k2 = jax.random.split(key)
    x = jax.random.normal(k1, (2, 4, 16, 16), dtype=jnp.float32)
    y = jax.random.normal(k2, (2, 4, 16, 16), dtype=jnp.float32)

    loss = jax.block_until_ready(pha_loss(x, y))
    ref = jax.block_until_ready(pha_loss_ref(x, y))

    # loose tolerance: bf16 DFT matmuls + atan polynomial vs f32 FFT; the few
    # mathematically-real bins (imag == 0) have an inherent +/-pi ambiguity.
    assert abs(float(loss) - float(ref)) < 0.1, (float(loss), float(ref))
    print("KERNEL_OK")
</pallas_src>

<mosaic_0001>
module attributes {stable_mosaic.version = 11 : i64} {
  func.func @kernel(%arg0: i32, %arg1: memref<16x128xbf16, #tpu.memory_space<vmem>>, %arg2: memref<16x128xbf16, #tpu.memory_space<vmem>>, %arg3: memref<16x16xbf16, #tpu.memory_space<vmem>>, %arg4: memref<16x16xbf16, #tpu.memory_space<vmem>>, %arg5: memref<128x128xbf16, #tpu.memory_space<vmem>>, %arg6: memref<128x128xbf16, #tpu.memory_space<vmem>>, %arg7: memref<1x1xf32, #tpu.memory_space<vmem>>, %arg8: memref<16x128xf32, #tpu.memory_space<vmem>>) attributes {dimension_semantics = [#tpu.dimension_semantics<arbitrary>], iteration_bounds = array<i64: 1>, scalar_prefetch = 0 : i64, scratch_operands = 1 : i64, tpu.core_type = #tpu.core_type<tc>, window_params = [{transform_indices = @transform_0, window_bounds = array<i64: 16, 128>}, {transform_indices = @transform_1, window_bounds = array<i64: 16, 128>}, {pipeline_mode = #tpu.pipeline_mode<synchronous>, transform_indices = @transform_2, window_bounds = array<i64: 16, 16>}, {pipeline_mode = #tpu.pipeline_mode<synchronous>, transform_indices = @transform_3, window_bounds = array<i64: 16, 16>}, {pipeline_mode = #tpu.pipeline_mode<synchronous>, transform_indices = @transform_4, window_bounds = array<i64: 128, 128>}, {pipeline_mode = #tpu.pipeline_mode<synchronous>, transform_indices = @transform_5, window_bounds = array<i64: 128, 128>}, {pipeline_mode = #tpu.pipeline_mode<synchronous>, transform_indices = @transform_6, window_bounds = array<i64: 1, 1>}]} {
    %c0_i32 = arith.constant 0 : i32
    %0 = arith.cmpi eq, %arg0, %c0_i32 : i32
    %1 = arith.extui %0 : i1 to i32
    %c0_i32_0 = arith.constant 0 : i32
    %2 = arith.cmpi ne, %1, %c0_i32_0 : i32
    scf.if %2 {
      %cst_59 = arith.constant 0.000000e+00 : f32
      %135 = vector.broadcast %cst_59 : f32 to vector<1x1xf32>
      %c0_60 = arith.constant 0 : index
      %c0_61 = arith.constant 0 : index
      %136 = vector.load %arg7[%c0_60, %c0_61] : memref<1x1xf32, #tpu.memory_space<vmem>>, vector<1x1xf32>
      tpu.vector_store %arg7[%c0_60, %c0_61], %135 {strides = array<i32>} : memref<1x1xf32, #tpu.memory_space<vmem>>, vector<1x1xf32>,
      %cst_62 = arith.constant 0.000000e+00 : f32
      %137 = vector.broadcast %cst_62 : f32 to vector<16x128xf32>
      %c0_63 = arith.constant 0 : index
      %c0_64 = arith.constant 0 : index
      %138 = vector.load %arg8[%c0_63, %c0_64] : memref<16x128xf32, #tpu.memory_space<vmem>>, vector<16x128xf32>
      tpu.vector_store %arg8[%c0_63, %c0_64], %137 {strides = array<i32>} : memref<16x128xf32, #tpu.memory_space<vmem>>, vector<16x128xf32>,
    } else {
    }
    %c0 = arith.constant 0 : index
    %c0_1 = arith.constant 0 : index
    %3 = vector.load %arg3[%c0, %c0_1] : memref<16x16xbf16, #tpu.memory_space<vmem>>, vector<16x16xbf16>
    %c0_2 = arith.constant 0 : index
    %c0_3 = arith.constant 0 : index
    %4 = vector.load %arg4[%c0_2, %c0_3] : memref<16x16xbf16, #tpu.memory_space<vmem>>, vector<16x16xbf16>
    %c0_4 = arith.constant 0 : index
    %c0_5 = arith.constant 0 : index
    %5 = vector.load %arg5[%c0_4, %c0_5] : memref<128x128xbf16, #tpu.memory_space<vmem>>, vector<128x128xbf16>
    %c0_6 = arith.constant 0 : index
    %c0_7 = arith.constant 0 : index
    %6 = vector.load %arg6[%c0_6, %c0_7] : memref<128x128xbf16, #tpu.memory_space<vmem>>, vector<128x128xbf16>
    %c0_8 = arith.constant 0 : index
    %c0_9 = arith.constant 0 : index
    %7 = vector.load %arg1[%c0_8, %c0_9] : memref<16x128xbf16, #tpu.memory_space<vmem>>, vector<16x128xbf16>
    %cst = arith.constant dense<0.000000e+00> : vector<16x128xf32>
    %8 = tpu.matmul %3, %7, %cst {dimension_numbers = #tpu.dot_dimension_numbers<[1], [0], [0], [1], [0, 0, 1, 1], [], []>} : vector<16x16xbf16>, vector<16x128xbf16>, vector<16x128xf32> -> vector<16x128xf32>
    %cst_10 = arith.constant dense<0.000000e+00> : vector<16x128xf32>
    %9 = tpu.matmul %4, %7, %cst_10 {dimension_numbers = #tpu.dot_dimension_numbers<[1], [0], [0], [1], [0, 0, 1, 1], [], []>} : vector<16x16xbf16>, vector<16x128xbf16>, vector<16x128xf32> -> vector<16x128xf32>
    %10 = arith.truncf %8 : vector<16x128xf32> to vector<16x128xbf16>
    %11 = arith.truncf %9 : vector<16x128xf32> to vector<16x128xbf16>
    %cst_11 = arith.constant dense<0.000000e+00> : vector<16x128xf32>
    %12 = tpu.matmul %10, %5, %cst_11 {dimension_numbers = #tpu.dot_dimension_numbers<[1], [0], [0], [1], [0, 0, 1, 1], [], []>} : vector<16x128xbf16>, vector<128x128xbf16>, vector<16x128xf32> -> vector<16x128xf32>
    %cst_12 = arith.constant dense<0.000000e+00> : vector<16x128xf32>
    %13 = tpu.matmul %11, %6, %cst_12 {dimension_numbers = #tpu.dot_dimension_numbers<[1], [0], [0], [1], [0, 0, 1, 1], [], []>} : vector<16x128xbf16>, vector<128x128xbf16>, vector<16x128xf32> -> vector<16x128xf32>
    %14 = arith.subf %12, %13 : vector<16x128xf32>
    %cst_13 = arith.constant dense<0.000000e+00> : vector<16x128xf32>
    %15 = tpu.matmul %10, %6, %cst_13 {dimension_numbers = #tpu.dot_dimension_numbers<[1], [0], [0], [1], [0, 0, 1, 1], [], []>} : vector<16x128xbf16>, vector<128x128xbf16>, vector<16x128xf32> -> vector<16x128xf32>
    %cst_14 = arith.constant dense<0.000000e+00> : vector<16x128xf32>
    %16 = tpu.matmul %11, %5, %cst_14 {dimension_numbers = #tpu.dot_dimension_numbers<[1], [0], [0], [1], [0, 0, 1, 1], [], []>} : vector<16x128xbf16>, vector<128x128xbf16>, vector<16x128xf32> -> vector<16x128xf32>
    %17 = arith.addf %15, %16 : vector<16x128xf32>
    %18 = math.absf %17 : vector<16x128xf32>
    %19 = math.absf %14 : vector<16x128xf32>
    %20 = arith.maximumf %19, %18 : vector<16x128xf32>
    %21 = arith.minimumf %19, %18 : vector<16x128xf32>
    %cst_15 = arith.constant 1.000000e-30 : f32
    %22 = vector.broadcast %cst_15 : f32 to vector<16x128xf32>
    %23 = arith.maximumf %20, %22 : vector<16x128xf32>
    %24 = tpu.reciprocal %23 {approx = true} : vector<16x128xf32> -> vector<16x128xf32>
    %25 = arith.mulf %21, %24 : vector<16x128xf32>
    %cst_16 = arith.constant 0.414213568 : f32
    %26 = vector.broadcast %cst_16 : f32 to vector<16x128xf32>
    %27 = arith.cmpf ogt, %25, %26 : vector<16x128xf32>
    %cst_17 = arith.constant 1.000000e+00 : f32
    %28 = vector.broadcast %cst_17 : f32 to vector<16x128xf32>
    %29 = arith.subf %25, %28 : vector<16x128xf32>
    %cst_18 = arith.constant 1.000000e+00 : f32
    %30 = vector.broadcast %cst_18 : f32 to vector<16x128xf32>
    %31 = arith.addf %25, %30 : vector<16x128xf32>
    %32 = tpu.reciprocal %31 {approx = true} : vector<16x128xf32> -> vector<16x128xf32>
    %33 = arith.mulf %29, %32 : vector<16x128xf32>
    %34 = arith.select %27, %33, %25 : vector<16x128xi1>, vector<16x128xf32>
    %cst_19 = arith.constant 0.785398185 : f32
    %cst_20 = arith.constant 0.000000e+00 : f32
    %35 = vector.broadcast %cst_19 : f32 to vector<16x128xf32>
    %36 = vector.broadcast %cst_20 : f32 to vector<16x128xf32>
    %37 = arith.select %27, %35, %36 : vector<16x128xi1>, vector<16x128xf32>
    %38 = arith.mulf %34, %34 : vector<16x128xf32>
    %cst_21 = arith.constant 0.0805374458 : f32
    %39 = vector.broadcast %cst_21 : f32 to vector<16x128xf32>
    %40 = arith.mulf %39, %38 : vector<16x128xf32>
    %cst_22 = arith.constant 0.138776854 : f32
    %41 = vector.broadcast %cst_22 : f32 to vector<16x128xf32>
    %42 = arith.subf %40, %41 : vector<16x128xf32>
    %43 = arith.mulf %42, %38 : vector<16x128xf32>
    %cst_23 = arith.constant 0.199777111 : f32
    %44 = vector.broadcast %cst_23 : f32 to vector<16x128xf32>
    %45 = arith.addf %43, %44 : vector<16x128xf32>
    %46 = arith.mulf %45, %38 : vector<16x128xf32>
    %cst_24 = arith.constant 0.333329499 : f32
    %47 = vector.broadcast %cst_24 : f32 to vector<16x128xf32>
    %48 = arith.subf %46, %47 : vector<16x128xf32>
    %49 = arith.mulf %48, %38 : vector<16x128xf32>
    %50 = arith.mulf %49, %34 : vector<16x128xf32>
    %51 = arith.addf %37, %50 : vector<16x128xf32>
    %52 = arith.addf %51, %34 : vector<16x128xf32>
    %53 = arith.cmpf ogt, %18, %19 : vector<16x128xf32>
    %cst_25 = arith.constant 1.57079637 : f32
    %54 = vector.broadcast %cst_25 : f32 to vector<16x128xf32>
    %55 = arith.subf %54, %52 : vector<16x128xf32>
    %56 = arith.select %53, %55, %52 : vector<16x128xi1>, vector<16x128xf32>
    %cst_26 = arith.constant 0.000000e+00 : f32
    %57 = vector.broadcast %cst_26 : f32 to vector<16x128xf32>
    %58 = arith.cmpf olt, %14, %57 : vector<16x128xf32>
    %cst_27 = arith.constant 3.14159274 : f32
    %59 = vector.broadcast %cst_27 : f32 to vector<16x128xf32>
    %60 = arith.subf %59, %56 : vector<16x128xf32>
    %61 = arith.select %58, %60, %56 : vector<16x128xi1>, vector<16x128xf32>
    %cst_28 = arith.constant 0.000000e+00 : f32
    %62 = vector.broadcast %cst_28 : f32 to vector<16x128xf32>
    %63 = arith.cmpf olt, %17, %62 : vector<16x128xf32>
    %cst_29 = arith.constant 0.000000e+00 : f32
    %64 = vector.broadcast %cst_29 : f32 to vector<16x128xf32>
    %65 = arith.subf %64, %61 : vector<16x128xf32>
    %66 = arith.select %63, %65, %61 : vector<16x128xi1>, vector<16x128xf32>
    %c0_30 = arith.constant 0 : index
    %c0_31 = arith.constant 0 : index
    %67 = vector.load %arg2[%c0_30, %c0_31] : memref<16x128xbf16, #tpu.memory_space<vmem>>, vector<16x128xbf16>
    %cst_32 = arith.constant dense<0.000000e+00> : vector<16x128xf32>
    %68 = tpu.matmul %3, %67, %cst_32 {dimension_numbers = #tpu.dot_dimension_numbers<[1], [0], [0], [1], [0, 0, 1, 1], [], []>} : vector<16x16xbf16>, vector<16x128xbf16>, vector<16x128xf32> -> vector<16x128xf32>
    %cst_33 = arith.constant dense<0.000000e+00> : vector<16x128xf32>
    %69 = tpu.matmul %4, %67, %cst_33 {dimension_numbers = #tpu.dot_dimension_numbers<[1], [0], [0], [1], [0, 0, 1, 1], [], []>} : vector<16x16xbf16>, vector<16x128xbf16>, vector<16x128xf32> -> vector<16x128xf32>
    %70 = arith.truncf %68 : vector<16x128xf32> to vector<16x128xbf16>
    %71 = arith.truncf %69 : vector<16x128xf32> to vector<16x128xbf16>
    %cst_34 = arith.constant dense<0.000000e+00> : vector<16x128xf32>
    %72 = tpu.matmul %70, %5, %cst_34 {dimension_numbers = #tpu.dot_dimension_numbers<[1], [0], [0], [1], [0, 0, 1, 1], [], []>} : vector<16x128xbf16>, vector<128x128xbf16>, vector<16x128xf32> -> vector<16x128xf32>
    %cst_35 = arith.constant dense<0.000000e+00> : vector<16x128xf32>
    %73 = tpu.matmul %71, %6, %cst_35 {dimension_numbers = #tpu.dot_dimension_numbers<[1], [0], [0], [1], [0, 0, 1, 1], [], []>} : vector<16x128xbf16>, vector<128x128xbf16>, vector<16x128xf32> -> vector<16x128xf32>
    %74 = arith.subf %72, %73 : vector<16x128xf32>
    %cst_36 = arith.constant dense<0.000000e+00> : vector<16x128xf32>
    %75 = tpu.matmul %70, %6, %cst_36 {dimension_numbers = #tpu.dot_dimension_numbers<[1], [0], [0], [1], [0, 0, 1, 1], [], []>} : vector<16x128xbf16>, vector<128x128xbf16>, vector<16x128xf32> -> vector<16x128xf32>
    %cst_37 = arith.constant dense<0.000000e+00> : vector<16x128xf32>
    %76 = tpu.matmul %71, %5, %cst_37 {dimension_numbers = #tpu.dot_dimension_numbers<[1], [0], [0], [1], [0, 0, 1, 1], [], []>} : vector<16x128xbf16>, vector<128x128xbf16>, vector<16x128xf32> -> vector<16x128xf32>
    %77 = arith.addf %75, %76 : vector<16x128xf32>
    %78 = math.absf %77 : vector<16x128xf32>
    %79 = math.absf %74 : vector<16x128xf32>
    %80 = arith.maximumf %79, %78 : vector<16x128xf32>
    %81 = arith.minimumf %79, %78 : vector<16x128xf32>
    %cst_38 = arith.constant 1.000000e-30 : f32
    %82 = vector.broadcast %cst_38 : f32 to vector<16x128xf32>
    %83 = arith.maximumf %80, %82 : vector<16x128xf32>
    %84 = tpu.reciprocal %83 {approx = true} : vector<16x128xf32> -> vector<16x128xf32>
    %85 = arith.mulf %81, %84 : vector<16x128xf32>
    %cst_39 = arith.constant 0.414213568 : f32
    %86 = vector.broadcast %cst_39 : f32 to vector<16x128xf32>
    %87 = arith.cmpf ogt, %85, %86 : vector<16x128xf32>
    %cst_40 = arith.constant 1.000000e+00 : f32
    %88 = vector.broadcast %cst_40 : f32 to vector<16x128xf32>
    %89 = arith.subf %85, %88 : vector<16x128xf32>
    %cst_41 = arith.constant 1.000000e+00 : f32
    %90 = vector.broadcast %cst_41 : f32 to vector<16x128xf32>
    %91 = arith.addf %85, %90 : vector<16x128xf32>
    %92 = tpu.reciprocal %91 {approx = true} : vector<16x128xf32> -> vector<16x128xf32>
    %93 = arith.mulf %89, %92 : vector<16x128xf32>
    %94 = arith.select %87, %93, %85 : vector<16x128xi1>, vector<16x128xf32>
    %cst_42 = arith.constant 0.785398185 : f32
    %cst_43 = arith.constant 0.000000e+00 : f32
    %95 = vector.broadcast %cst_42 : f32 to vector<16x128xf32>
    %96 = vector.broadcast %cst_43 : f32 to vector<16x128xf32>
    %97 = arith.select %87, %95, %96 : vector<16x128xi1>, vector<16x128xf32>
    %98 = arith.mulf %94, %94 : vector<16x128xf32>
    %cst_44 = arith.constant 0.0805374458 : f32
    %99 = vector.broadcast %cst_44 : f32 to vector<16x128xf32>
    %100 = arith.mulf %99, %98 : vector<16x128xf32>
    %cst_45 = arith.constant 0.138776854 : f32
    %101 = vector.broadcast %cst_45 : f32 to vector<16x128xf32>
    %102 = arith.subf %100, %101 : vector<16x128xf32>
    %103 = arith.mulf %102, %98 : vector<16x128xf32>
    %cst_46 = arith.constant 0.199777111 : f32
    %104 = vector.broadcast %cst_46 : f32 to vector<16x128xf32>
    %105 = arith.addf %103, %104 : vector<16x128xf32>
    %106 = arith.mulf %105, %98 : vector<16x128xf32>
    %cst_47 = arith.constant 0.333329499 : f32
    %107 = vector.broadcast %cst_47 : f32 to vector<16x128xf32>
    %108 = arith.subf %106, %107 : vector<16x128xf32>
    %109 = arith.mulf %108, %98 : vector<16x128xf32>
    %110 = arith.mulf %109, %94 : vector<16x128xf32>
    %111 = arith.addf %97, %110 : vector<16x128xf32>
    %112 = arith.addf %111, %94 : vector<16x128xf32>
    %113 = arith.cmpf ogt, %78, %79 : vector<16x128xf32>
    %cst_48 = arith.constant 1.57079637 : f32
    %114 = vector.broadcast %cst_48 : f32 to vector<16x128xf32>
    %115 = arith.subf %114, %112 : vector<16x128xf32>
    %116 = arith.select %113, %115, %112 : vector<16x128xi1>, vector<16x128xf32>
    %cst_49 = arith.constant 0.000000e+00 : f32
    %117 = vector.broadcast %cst_49 : f32 to vector<16x128xf32>
    %118 = arith.cmpf olt, %74, %117 : vector<16x128xf32>
    %cst_50 = arith.constant 3.14159274 : f32
    %119 = vector.broadcast %cst_50 : f32 to vector<16x128xf32>
    %120 = arith.subf %119, %116 : vector<16x128xf32>
    %121 = arith.select %118, %120, %116 : vector<16x128xi1>, vector<16x128xf32>
    %cst_51 = arith.constant 0.000000e+00 : f32
    %122 = vector.broadcast %cst_51 : f32 to vector<16x128xf32>
    %123 = arith.cmpf olt, %77, %122 : vector<16x128xf32>
    %cst_52 = arith.constant 0.000000e+00 : f32
    %124 = vector.broadcast %cst_52 : f32 to vector<16x128xf32>
    %125 = arith.subf %124, %121 : vector<16x128xf32>
    %126 = arith.select %123, %125, %121 : vector<16x128xi1>, vector<16x128xf32>
    %c0_53 = arith.constant 0 : index
    %c0_54 = arith.constant 0 : index
    %127 = vector.load %arg8[%c0_53, %c0_54] : memref<16x128xf32, #tpu.memory_space<vmem>>, vector<16x128xf32>
    %128 = arith.subf %66, %126 : vector<16x128xf32>
    %129 = math.absf %128 : vector<16x128xf32>
    %130 = arith.addf %127, %129 : vector<16x128xf32>
    %c0_55 = arith.constant 0 : index
    %c0_56 = arith.constant 0 : index
    %131 = vector.load %arg8[%c0_55, %c0_56] : memref<16x128xf32, #tpu.memory_space<vmem>>, vector<16x128xf32>
    tpu.vector_store %arg8[%c0_55, %c0_56], %130 {strides = array<i32>} : memref<16x128xf32, #tpu.memory_space<vmem>>, vector<16x128xf32>,
    %c0_i32_57 = arith.constant 0 : i32
    %132 = arith.cmpi eq, %arg0, %c0_i32_57 : i32
    %133 = arith.extui %132 : i1 to i32
    %c0_i32_58 = arith.constant 0 : i32
    %134 = arith.cmpi ne, %133, %c0_i32_58 : i32
    scf.if %134 {
      %c0_59 = arith.constant 0 : index
      %c0_60 = arith.constant 0 : index
      %135 = vector.load %arg7[%c0_59, %c0_60] : memref<1x1xf32, #tpu.memory_space<vmem>>, vector<1x1xf32>
      %c0_61 = arith.constant 0 : index
      %c0_62 = arith.constant 0 : index
      %136 = vector.load %arg8[%c0_61, %c0_62] : memref<16x128xf32, #tpu.memory_space<vmem>>, vector<16x128xf32>
      %137 = vector.shape_cast %136 : vector<16x128xf32> to vector<1x16x128xf32>
      %cst_63 = arith.constant dense<0.000000e+00> : vector<1xf32>
      %138 = vector.multi_reduction <add>, %137, %cst_63 [1, 2] : vector<1x16x128xf32> to vector<1xf32>
      %139 = vector.shape_cast %138 : vector<1xf32> to vector<1x1x1xf32>
      %140 = vector.extract %139[0, 0, 0] : f32 from vector<1x1x1xf32>
      %cst_64 = arith.constant 8.68055562E-4 : f32
      %141 = arith.mulf %140, %cst_64 : f32
      %142 = vector.broadcast %141 : f32 to vector<1x1xf32>
      %143 = arith.addf %135, %142 : vector<1x1xf32>
      %c0_65 = arith.constant 0 : index
      %c0_66 = arith.constant 0 : index
      %144 = vector.load %arg7[%c0_65, %c0_66] : memref<1x1xf32, #tpu.memory_space<vmem>>, vector<1x1xf32>
      tpu.vector_store %arg7[%c0_65, %c0_66], %143 {strides = array<i32>} : memref<1x1xf32, #tpu.memory_space<vmem>>, vector<1x1xf32>,
    } else {
    }
    return
  }
  func.func @transform_0(%arg0: i32) -> (i32, i32) {
    %c0_i32 = arith.constant 0 : i32
    %c0_i32_0 = arith.constant 0 : i32
    return %c0_i32, %arg0 : i32, i32
  }
  func.func @transform_1(%arg0: i32) -> (i32, i32) {
    %c0_i32 = arith.constant 0 : i32
    %c0_i32_0 = arith.constant 0 : i32
    return %c0_i32, %arg0 : i32, i32
  }
  func.func @transform_2(%arg0: i32) -> (i32, i32) {
    %c0_i32 = arith.constant 0 : i32
    %c0_i32_0 = arith.constant 0 : i32
    %c0_i32_1 = arith.constant 0 : i32
    return %c0_i32, %c0_i32_0 : i32, i32
  }
  func.func @transform_3(%arg0: i32) -> (i32, i32) {
    %c0_i32 = arith.constant 0 : i32
    %c0_i32_0 = arith.constant 0 : i32
    %c0_i32_1 = arith.constant 0 : i32
    return %c0_i32, %c0_i32_0 : i32, i32
  }
  func.func @transform_4(%arg0: i32) -> (i32, i32) {
    %c0_i32 = arith.constant 0 : i32
    %c0_i32_0 = arith.constant 0 : i32
    %c0_i32_1 = arith.constant 0 : i32
    return %c0_i32, %c0_i32_0 : i32, i32
  }
  func.func @transform_5(%arg0: i32) -> (i32, i32) {
    %c0_i32 = arith.constant 0 : i32
    %c0_i32_0 = arith.constant 0 : i32
    %c0_i32_1 = arith.constant 0 : i32
    return %c0_i32, %c0_i32_0 : i32, i32
  }
  func.func @transform_6(%arg0: i32) -> (i32, i32) {
    %c0_i32 = arith.constant 0 : i32
    %c0_i32_0 = arith.constant 0 : i32
    %c0_i32_1 = arith.constant 0 : i32
    return %c0_i32, %c0_i32_0 : i32, i32
  }
}

</mosaic_0001>

<bundles_post_ra>
// kernel: tpu_custom_call.1
= control target key start
LH: loop header
LB: loop body
LE: loop exit
PB: predicated region body
PF: predicated region fallthrough
CT: control target
= control target key end

     0   :  { %11 = vsyncpa [#allocation4], 0  ;;  %s1886_s0 = inlined_call_operand.hbm [shape: bf16[16,128], index: 0, kind: input, shape index: {}]   ;;  %s1887_s1 = inlined_call_operand.hbm [shape: bf16[16,128], index: 1, kind: input, shape index: {}]   ;;  %s1888_s2 = inlined_call_operand.hbm [shape: bf16[16,16], index: 2, kind: input, shape index: {}]   ;;  %s1889_s3 = inlined_call_operand.vmem [shape: bf16[16,16], index: 3, kind: input, shape index: {}]   ;;  %s1890_s4 = inlined_call_operand.hbm [shape: bf16[128,128], index: 4, kind: input, shape index: {}]   ;;  %s1891_s5 = inlined_call_operand.hbm [shape: bf16[128,128], index: 5, kind: input, shape index: {}]   ;;  %s1892_s6 = inlined_call_operand.hbm [shape: f32[1,1], index: 6, kind: output, shape index: {}]  }
   0x1   :  { %12 = vsyncpa [#allocation7], 0 }
   0x2   :  { %13 = vsyncpa [#allocation10], 0 }
   0x3   :  { %14 = vsyncpa [#allocation5], 0  ;;  %s1446_s21 = smov [#allocation6]   ;;  %s1447_s23 = smov [#allocation9]  }
   0x4   :  { %s32_s22 = sshll.u32 %s1446_s21, 4  ;;  %s58_s24 = sshll.u32 %s1447_s23, 4  ;;  %s33_s22 = int_to_ptr.vmem [resolvable:$true] %s32_s22  ;;  %s1491_s24 = int_to_ptr.vmem [resolvable:$true] %s58_s24 }
   0x5   :  { %s1306_s27 = scalar_lea.hbm %s1887_s1, 128 }
   0x6   :  { %p1307_p0 = scmp.ne.s32.totalorder %s1887_s1, %s1306_s27  ;;  %p1310_p1 = scmp.lt.u32.totalorder %s1306_s27, %s1887_s1 }
   0x8   :  { %p1312_p2 = pnand %p1310_p1, %p1307_p0 }
   0xa   :  { %1315 = shalt.err (!%p1312_p2)
}
   0xb   :  { %s1316_s8 = scalar_lea.vmem %s33_s22, 128  ;;  %p1321_p4 = scmp.lt.s32.totalorder %s33_s22, %s33_s22 }
   0xc   :  { %p1317_p3 = scmp.ne.s32.totalorder %s33_s22, %s1316_s8  ;;  %p1322_p5 = scmp.lt.s32.totalorder %s1316_s8, %s1316_s8 }
   0xe   :  { %p1323_p6 = por %p1322_p5, %p1321_p4 }
  0x10   :  { %p1324_p7 = pnand %p1323_p6, %p1317_p3 }
  0x12   :  { %1327 = shalt.err (!%p1324_p7)
}
  0x13   :  { %s1448_s9 = smov 64   ;;  %s1449_s10 = smov 4  }
  0x14   :  { %38 = dma.hbm_to_vmem [thread:$0]  %s1887_s1, 128, %s33_s22, [#allocation7], %s1448_s9, %s1448_s9, %s1449_s10  }
  0x15   :  { %s1328_s15 = scalar_lea.hbm %s1890_s4, 1024 }
  0x16   :  { %p1329_p8 = scmp.ne.s32.totalorder %s1890_s4, %s1328_s15  ;;  %p1332_p9 = scmp.lt.u32.totalorder %s1328_s15, %s1890_s4 }
  0x18   :  { %p1334_p10 = pnand %p1332_p9, %p1329_p8 }
  0x1a   :  { %1337 = shalt.err (!%p1334_p10)
}
  0x1b   :  { %s1338_s20 = scalar_lea.vmem %s1491_s24, 1024  ;;  %p1343_p12 = scmp.lt.s32.totalorder %s1491_s24, %s1491_s24 }
  0x1c   :  { %p1339_p11 = scmp.ne.s32.totalorder %s1491_s24, %s1338_s20  ;;  %p1344_p13 = scmp.lt.s32.totalorder %s1338_s20, %s1338_s20 }
  0x1e   :  { %p1345_p0 = por %p1344_p13, %p1343_p12 }
  0x20   :  { %p1346_p1 = pnand %p1345_p0, %p1339_p11 }
  0x22   :  { %1349 = shalt.err (!%p1346_p1)
}
  0x23   :  { %64 = dma.hbm_to_vmem [thread:$0]  %s1890_s4, 1024, %s1491_s24, [#allocation10], %s1448_s9, %s1448_s9, %s1449_s10  }
  0x24   :  { %s1450_s22 = smov [#allocation3]   ;;  %s1451_s25 = smov [#allocation8]  }
  0x25   :  { %s20_s23 = sshll.u32 %s1450_s22, 4  ;;  %s44_s26 = sshll.u32 %s1451_s25, 4  ;;  %s21_s23 = int_to_ptr.vmem [resolvable:$true] %s20_s23  ;;  %s1528_s26 = int_to_ptr.vmem [resolvable:$true] %s44_s26 }
  0x26   :  { %s1350_s29 = scalar_lea.hbm %s1886_s0, 128 }
  0x27   :  { %p1351_p2 = scmp.ne.s32.totalorder %s1886_s0, %s1350_s29  ;;  %p1354_p3 = scmp.lt.u32.totalorder %s1350_s29, %s1886_s0 }
  0x29   :  { %p1356_p4 = pnand %p1354_p3, %p1351_p2 }
  0x2b   :  { %1359 = shalt.err (!%p1356_p4)
}
  0x2c   :  { %s1360_s4 = scalar_lea.vmem %s21_s23, 128  ;;  %p1365_p6 = scmp.lt.s32.totalorder %s21_s23, %s21_s23 }
  0x2d   :  { %p1361_p5 = scmp.ne.s32.totalorder %s21_s23, %s1360_s4  ;;  %p1366_p7 = scmp.lt.s32.totalorder %s1360_s4, %s1360_s4 }
  0x2f   :  { %p1367_p8 = por %p1366_p7, %p1365_p6 }
  0x31   :  { %p1368_p9 = pnand %p1367_p8, %p1361_p5 }
  0x33   :  { %1371 = shalt.err (!%p1368_p9)
}
  0x34   :  { %26 = dma.hbm_to_vmem [thread:$0]  %s1886_s0, 128, %s21_s23, [#allocation4], %s1448_s9, %s1448_s9, %s1449_s10  }
  0x35   :  { %s1372_s15 = scalar_lea.hbm %s1888_s2, 128 }
  0x36   :  { %p1373_p10 = scmp.ne.s32.totalorder %s1888_s2, %s1372_s15  ;;  %p1376_p11 = scmp.lt.u32.totalorder %s1372_s15, %s1888_s2 }
  0x38   :  { %p1378_p12 = pnand %p1376_p11, %p1373_p10 }
  0x3a   :  { %1381 = shalt.err (!%p1378_p12)
}
  0x3b   :  { %s1382_s20 = scalar_lea.vmem %s1528_s26, 128  ;;  %p1387_p0 = scmp.lt.s32.totalorder %s1528_s26, %s1528_s26 }
  0x3c   :  { %p1383_p13 = scmp.ne.s32.totalorder %s1528_s26, %s1382_s20  ;;  %p1388_p1 = scmp.lt.s32.totalorder %s1382_s20, %s1382_s20 }
  0x3e   :  { %p1389_p2 = por %p1388_p1, %p1387_p0 }
  0x40   :  { %p1390_p3 = pnand %p1389_p2, %p1383_p13 }
  0x42   :  { %1393 = shalt.err (!%p1390_p3)
}
  0x43   :  { %50 = dma.hbm_to_vmem [thread:$0]  %s1888_s2, 128, %s1528_s26, [#allocation7], %s1448_s9, %s1448_s9, %s1449_s10  }
  0x44   :  { %s1452_s21 = smov [#allocation11]   ;;  %s1394_s27 = scalar_lea.hbm %s1891_s5, 1024 }
  0x45   :  { %s70_s22 = sshll.u32 %s1452_s21, 4  ;;  %p1395_p4 = scmp.ne.s32.totalorder %s1891_s5, %s1394_s27  ;;  %s71_s22 = int_to_ptr.vmem [resolvable:$true] %s70_s22 }
  0x46   :  { %p1398_p5 = scmp.lt.u32.totalorder %s1394_s27, %s1891_s5 }
  0x48   :  { %p1400_p6 = pnand %p1398_p5, %p1395_p4 }
  0x4a   :  { %1403 = shalt.err (!%p1400_p6)
}
  0x4b   :  { %s1404_s8 = scalar_lea.vmem %s71_s22, 1024  ;;  %p1409_p8 = scmp.lt.s32.totalorder %s71_s22, %s71_s22 }
  0x4c   :  { %p1405_p7 = scmp.ne.s32.totalorder %s71_s22, %s1404_s8  ;;  %p1410_p9 = scmp.lt.s32.totalorder %s1404_s8, %s1404_s8 }
  0x4e   :  { %p1411_p10 = por %p1410_p9, %p1409_p8 }
  0x50   :  { %p1412_p11 = pnand %p1411_p10, %p1405_p7 }
  0x52   :  { %1415 = shalt.err (!%p1412_p11)
}
  0x53   :  { %76 = dma.hbm_to_vmem [thread:$0]  %s1891_s5, 1024, %s71_s22, [#allocation10], %s1448_s9, %s1448_s9, %s1449_s10  }
  0x54   :  { %1438 = dma.done.wait [#allocation4], 128  }
  0x55   :  { %1439 = vsyncadd [#allocation4], 4294967168 }
  0x56   :  { %1440 = dma.done.wait [#allocation7], 256  }
  0x57   :  { %1441 = vsyncadd [#allocation7], 4294967040 }
  0x58   :  { %1442 = dma.done.wait [#allocation10], 2048  }
  0x59   :  { %1443 = vsyncadd [#allocation10], 4294965248  ;;  %v1453_v0 = vmov 0.0   ;;  %vm1454_vm0 = vmmov 0   ;;  %v1270_v1 = vld [vmem:[#allocation3] sm:$0xff]   ;;  %v1586_v2 = vld [vmem:[#allocation8] sm:$0xff]  }
  0x5a   :  { %1066 = vmatprep.subr.bf16.mxu0 %v1453_v0  ;;  %1072 = vmatprep.subr.bf16.mxu1 %v1453_v0  ;;  %vm150_vm1 = vcmask 130048   ;;  %v1591_v3 = vld [vmem:[%s1889_s3] sm:$0xff]   ;;  %v1595_v4 = vld [vmem:[#allocation9] sm:$0xff]   ;;  %v1611_v6 = vld [vmem:[#allocation9 + $0x10] sm:$0xff]   ;;  %s1455_s11 = smov [#allocation12]  }
  0x5b   :  { %1068 = vmatprep.mubr.msk.bf16.mxu0 %vm1454_vm0, %v1453_v0  ;;  %1074 = vmatprep.mubr.msk.bf16.mxu1 %vm1454_vm0, %v1453_v0  ;;  %v1603_v5 = vld [vmem:[#allocation9 + $0x8] sm:$0xff]   ;;  %v1617_v7 = vld [vmem:[#allocation9 + $0x18] sm:$0xff]   ;;  %v1625_v8 = vld [vmem:[#allocation9 + $0x20] sm:$0xff]   ;;  %s939_s4 = sshll.u32 %s1455_s11, 4  ;;  %s940_s4 = int_to_ptr.vmem [resolvable:$true] %s939_s4 }
  0x5c   :  { %1067 = vmatpush3.bf16.msra.mxu0 %v1270_v1  ;;  %1073 = vmatpush3.bf16.msra.mxu1 %v1270_v1  ;;  %v1631_v9 = vld [vmem:[#allocation9 + $0x28] sm:$0xff]   ;;  %v1637_v10 = vld [vmem:[#allocation9 + $0x30] sm:$0xff]   ;;  %v1645_v11 = vld [vmem:[#allocation9 + $0x38] sm:$0xff]   ;;  %s1416_s24 = scalar_lea.vmem %s940_s4, 16  ;;  %s1420_s12 = scalar_lea.vmem %s940_s4, 32 }
  0x5d   :  { %1078 = vmatprep.subr.bf16.mxu1 %v1453_v0  ;;  %1118 = vmatprep.subr.bf16.mxu0 %v1453_v0  ;;  %v1651_v18 = vld [vmem:[#allocation11] sm:$0xff]   ;;  %v1655_v23 = vld [vmem:[#allocation11 + $0x8] sm:$0xff]   ;;  %v1665_v24 = vld [vmem:[#allocation11 + $0x10] sm:$0xff]   ;;  %p1417_p12 = scmp.ne.s32.totalorder %s940_s4, %s1416_s24  ;;  %p1421_p13 = scmp.lt.s32.totalorder %s940_s4, %s940_s4 }
  0x5e   :  { %v1671_v25 = vld [vmem:[#allocation11 + $0x18] sm:$0xff]   ;;  %v1677_v26 = vld [vmem:[#allocation11 + $0x20] sm:$0xff]   ;;  %v1683_v27 = vld [vmem:[#allocation11 + $0x28] sm:$0xff]   ;;  %p1422_p0 = scmp.lt.s32.totalorder %s1420_s12, %s1416_s24 }
  0x5f   :  { %1069 = vmatmul.mubr.msk.bf16.vlgmr.msra.gmra.mrb[0].mxu0 %vm150_vm1, %v1586_v2  ;;  %1075 = vmatmul.mubr.msk.bf16.vlgmr.msra.gmra.mrb[0].mxu1 %vm150_vm1, %v1591_v3  ;;  %v1689_v28 = vld [vmem:[#allocation11 + $0x30] sm:$0xff]   ;;  %v1695_v29 = vld [vmem:[#allocation11 + $0x38] sm:$0xff]  }
  0x60   :  { %1079 = vmatpush3.bf16.msra.mxu1 %v1595_v4  ;;  %1119 = vmatpush3.bf16.msra.mxu0 %v1595_v4  ;;  %v1289_v30 = vld [vmem:[#allocation6] sm:$0xff]   ;;  %p1423_p1 = por %p1422_p0, %p1421_p13 }
  0x61   :  { %1080 = vmatprep.subr.bf16.mxu1 %v1453_v0  ;;  %1120 = vmatprep.subr.bf16.mxu0 %v1453_v0 }
  0x62   :  { %1094 = vmatprep.mubr.msk.bf16.mxu1 %vm1454_vm0, %v1453_v0  ;;  %1134 = vmatprep.mubr.msk.bf16.mxu0 %vm1454_vm0, %v1453_v0  ;;  %p1424_p2 = pnand %p1423_p1, %p1417_p12 }
  0x64   :  { %1081 = vmatpush3.bf16.msra.mxu1 %v1603_v5  ;;  %1121 = vmatpush3.bf16.msra.mxu0 %v1603_v5 }
  0x65   :  { %1082 = vmatprep.subr.bf16.mxu1 %v1453_v0  ;;  %1122 = vmatprep.subr.bf16.mxu0 %v1453_v0 }
  0x68   :  { %1083 = vmatpush3.bf16.msra.mxu1 %v1611_v6  ;;  %1123 = vmatpush3.bf16.msra.mxu0 %v1611_v6 }
  0x69   :  { %1084 = vmatprep.subr.bf16.mxu1 %v1453_v0  ;;  %1124 = vmatprep.subr.bf16.mxu0 %v1453_v0 }
  0x6c   :  { %1085 = vmatpush3.bf16.msra.mxu1 %v1617_v7  ;;  %1125 = vmatpush3.bf16.msra.mxu0 %v1617_v7 }
  0x6d   :  { %1086 = vmatprep.subr.bf16.mxu1 %v1453_v0  ;;  %1126 = vmatprep.subr.bf16.mxu0 %v1453_v0 }
  0x70   :  { %1087 = vmatpush3.bf16.msra.mxu1 %v1625_v8  ;;  %1127 = vmatpush3.bf16.msra.mxu0 %v1625_v8 }
  0x71   :  { %1088 = vmatprep.subr.bf16.mxu1 %v1453_v0  ;;  %1128 = vmatprep.subr.bf16.mxu0 %v1453_v0 }
  0x74   :  { %1089 = vmatpush3.bf16.msra.mxu1 %v1631_v9  ;;  %1129 = vmatpush3.bf16.msra.mxu0 %v1631_v9 }
  0x75   :  { %1090 = vmatprep.subr.bf16.mxu1 %v1453_v0  ;;  %1130 = vmatprep.subr.bf16.mxu0 %v1453_v0 }
  0x78   :  { %1091 = vmatpush3.bf16.msra.mxu1 %v1637_v10  ;;  %1131 = vmatpush3.bf16.msra.mxu0 %v1637_v10 }
  0x79   :  { %1092 = vmatprep.subr.bf16.mxu1 %v1453_v0  ;;  %1132 = vmatprep.subr.bf16.mxu0 %v1453_v0 }
  0x7c   :  { %1093 = vmatpush3.bf16.msra.mxu1 %v1645_v11  ;;  %1133 = vmatpush3.bf16.msra.mxu0 %v1645_v11 }
  0x7d   :  { %1098 = vmatprep.subr.bf16.mxu1 %v1453_v0  ;;  %1138 = vmatprep.subr.bf16.mxu0 %v1453_v0 }
 0x132   :  { %v188_v12 = vpop.f32.mrb[0].mxu0  ;;  %v237_v13 = vpop.f32.mrb[0].mxu1 }
 0x133   :  { %v1070_v14 = vpop.f32.mrb[1].mxu0  ;;  %v1076_v15 = vpop.f32.mrb[1].mxu1 }
 0x134   :  { %v191_v16 = vpop.f32.mrb[2].mxu0  ;;  %v240_v17 = vpop.f32.mrb[2].mxu1 }
 0x135   :  { %v244_v19 = vpack.c.bf16 %v191_v16, %v188_v12  ;;  %v245_v20 = vpack.c.bf16 %v240_v17, %v237_v13  ;;  %v1071_v21 = vpop.f32.mrb[3].mxu0  ;;  %v1077_v22 = vpop.f32.mrb[3].mxu1 }
 0x137   :  { %1095 = vmatmul.mubr.bf16.vlgmr.msra.gmra.mrb[4].mxu1 %v244_v19  ;;  %1135 = vmatmul.mubr.bf16.vlgmr.msra.gmra.mrb[4].mxu0 %v245_v20 }
 0x138   :  { %1099 = vmatpush3.bf16.msra.mxu1 %v1651_v18  ;;  %1139 = vmatpush3.bf16.msra.mxu0 %v1651_v18 }
 0x139   :  { %1100 = vmatprep.subr.bf16.mxu1 %v1453_v0  ;;  %1140 = vmatprep.subr.bf16.mxu0 %v1453_v0 }
 0x13a   :  { %1114 = vmatprep.mubr.msk.bf16.mxu1 %vm1454_vm0, %v1453_v0  ;;  %1154 = vmatprep.mubr.msk.bf16.mxu0 %vm1454_vm0, %v1453_v0 }
 0x13c   :  { %1101 = vmatpush3.bf16.msra.mxu1 %v1655_v23  ;;  %1141 = vmatpush3.bf16.msra.mxu0 %v1655_v23 }
 0x13d   :  { %1102 = vmatprep.subr.bf16.mxu1 %v1453_v0  ;;  %1142 = vmatprep.subr.bf16.mxu0 %v1453_v0 }
 0x140   :  { %1103 = vmatpush3.bf16.msra.mxu1 %v1665_v24  ;;  %1143 = vmatpush3.bf16.msra.mxu0 %v1665_v24 }
 0x141   :  { %1104 = vmatprep.subr.bf16.mxu1 %v1453_v0  ;;  %1144 = vmatprep.subr.bf16.mxu0 %v1453_v0 }
 0x144   :  { %1105 = vmatpush3.bf16.msra.mxu1 %v1671_v25  ;;  %1145 = vmatpush3.bf16.msra.mxu0 %v1671_v25 }
 0x145   :  { %1106 = vmatprep.subr.bf16.mxu1 %v1453_v0  ;;  %1146 = vmatprep.subr.bf16.mxu0 %v1453_v0 }
 0x148   :  { %1107 = vmatpush3.bf16.msra.mxu1 %v1677_v26  ;;  %1147 = vmatpush3.bf16.msra.mxu0 %v1677_v26 }
 0x149   :  { %1108 = vmatprep.subr.bf16.mxu1 %v1453_v0  ;;  %1148 = vmatprep.subr.bf16.mxu0 %v1453_v0 }
 0x14c   :  { %1109 = vmatpush3.bf16.msra.mxu1 %v1683_v27  ;;  %1149 = vmatpush3.bf16.msra.mxu0 %v1683_v27 }
 0x14d   :  { %1110 = vmatprep.subr.bf16.mxu1 %v1453_v0  ;;  %1150 = vmatprep.subr.bf16.mxu0 %v1453_v0 }
 0x150   :  { %1111 = vmatpush3.bf16.msra.mxu1 %v1689_v28  ;;  %1151 = vmatpush3.bf16.msra.mxu0 %v1689_v28 }
 0x151   :  { %1112 = vmatprep.subr.bf16.mxu1 %v1453_v0  ;;  %1152 = vmatprep.subr.bf16.mxu0 %v1453_v0 }
 0x154   :  { %1113 = vmatpush3.bf16.msra.mxu1 %v1695_v29  ;;  %1153 = vmatpush3.bf16.msra.mxu0 %v1695_v29 }
 0x155   :  { %1158 = vmatprep.subr.bf16.mxu0 %v1453_v0  ;;  %1164 = vmatprep.subr.bf16.mxu1 %v1453_v0 }
 0x157   :  { %1115 = vmatmul.mubr.bf16.vlgmr.msra.gmra.mrb[8].mxu1 %v245_v20  ;;  %1155 = vmatmul.mubr.bf16.vlgmr.msra.gmra.mrb[4].mxu0 %v244_v19 }
 0x158   :  { %1159 = vmatpush3.bf16.msra.mxu0 %v1289_v30  ;;  %1165 = vmatpush3.bf16.msra.mxu1 %v1289_v30 }
 0x159   :  { %1160 = vmatprep.mubr.msk.bf16.mxu0 %vm1454_vm0, %v1453_v0  ;;  %1166 = vmatprep.mubr.msk.bf16.mxu1 %vm1454_vm0, %v1453_v0 }
 0x15a   :  { %1170 = vmatprep.subr.bf16.mxu1 %v1453_v0  ;;  %1210 = vmatprep.subr.bf16.mxu0 %v1453_v0 }
 0x15f   :  { %1161 = vmatmul.mubr.msk.bf16.vlgmr.msra.gmra.mrb[8].mxu0 %vm150_vm1, %v1586_v2  ;;  %1167 = vmatmul.mubr.msk.bf16.vlgmr.msra.gmra.mrb[12].mxu1 %vm150_vm1, %v1591_v3 }
 0x160   :  { %1171 = vmatpush3.bf16.msra.mxu1 %v1595_v4  ;;  %1211 = vmatpush3.bf16.msra.mxu0 %v1595_v4 }
 0x161   :  { %1172 = vmatprep.subr.bf16.mxu1 %v1453_v0  ;;  %1212 = vmatprep.subr.bf16.mxu0 %v1453_v0 }
 0x162   :  { %1186 = vmatprep.mubr.msk.bf16.mxu1 %vm1454_vm0, %v1453_v0  ;;  %1226 = vmatprep.mubr.msk.bf16.mxu0 %vm1454_vm0, %v1453_v0 }
 0x164   :  { %1173 = vmatpush3.bf16.msra.mxu1 %v1603_v5  ;;  %1213 = vmatpush3.bf16.msra.mxu0 %v1603_v5 }
 0x165   :  { %1174 = vmatprep.subr.bf16.mxu1 %v1453_v0  ;;  %1214 = vmatprep.subr.bf16.mxu0 %v1453_v0 }
 0x168   :  { %1175 = vmatpush3.bf16.msra.mxu1 %v1611_v6  ;;  %1215 = vmatpush3.bf16.msra.mxu0 %v1611_v6 }
 0x169   :  { %1176 = vmatprep.subr.bf16.mxu1 %v1453_v0  ;;  %1216 = vmatprep.subr.bf16.mxu0 %v1453_v0 }
 0x16c   :  { %1177 = vmatpush3.bf16.msra.mxu1 %v1617_v7  ;;  %1217 = vmatpush3.bf16.msra.mxu0 %v1617_v7 }
 0x16d   :  { %1178 = vmatprep.subr.bf16.mxu1 %v1453_v0  ;;  %1218 = vmatprep.subr.bf16.mxu0 %v1453_v0 }
 0x170   :  { %1179 = vmatpush3.bf16.msra.mxu1 %v1625_v8  ;;  %1219 = vmatpush3.bf16.msra.mxu0 %v1625_v8 }
 0x171   :  { %1180 = vmatprep.subr.bf16.mxu1 %v1453_v0  ;;  %1220 = vmatprep.subr.bf16.mxu0 %v1453_v0 }
 0x174   :  { %1181 = vmatpush3.bf16.msra.mxu1 %v1631_v9  ;;  %1221 = vmatpush3.bf16.msra.mxu0 %v1631_v9 }
 0x175   :  { %1182 = vmatprep.subr.bf16.mxu1 %v1453_v0  ;;  %1222 = vmatprep.subr.bf16.mxu0 %v1453_v0 }
 0x178   :  { %1183 = vmatpush3.bf16.msra.mxu1 %v1637_v10  ;;  %1223 = vmatpush3.bf16.msra.mxu0 %v1637_v10 }
 0x179   :  { %1184 = vmatprep.subr.bf16.mxu1 %v1453_v0  ;;  %1224 = vmatprep.subr.bf16.mxu0 %v1453_v0 }
 0x17c   :  { %1185 = vmatpush3.bf16.msra.mxu1 %v1645_v11  ;;  %1225 = vmatpush3.bf16.msra.mxu0 %v1645_v11 }
 0x17d   :  { %1190 = vmatprep.subr.bf16.mxu1 %v1453_v0  ;;  %1230 = vmatprep.subr.bf16.mxu0 %v1453_v0 }
 0x20a   :  { %v328_v31 = vpop.f32.mrb[4].mxu1 }
 0x20b   :  { %v1096_v32 = vpop.f32.mrb[5].mxu1 }
 0x20c   :  { %v331_v33 = vpop.f32.mrb[6].mxu1 }
 0x20d   :  { %v1097_v34 = vpop.f32.mrb[7].mxu1 }
 0x22a   :  { %v417_v35 = vpop.f32.mrb[8].mxu1  ;;  %v1749_v36 = vpop.f32.mrb[4].mxu0 }
 0x22b   :  { %v1751_v37 = vsub.f32 %v328_v31, %v417_v35  ;;  %v1116_v38 = vpop.f32.mrb[9].mxu1  ;;  %v1156_v39 = vpop.f32.mrb[5].mxu0  ;;  %v1759_v43 = vand.u32 2147483647, %v1749_v36  ;;  %vm570_vm8 = vcmp.lt.f32.partialorder %v1749_v36, 0.0 }
 0x22c   :  { %v420_v40 = vpop.f32.mrb[10].mxu1  ;;  %v1753_v41 = vpop.f32.mrb[6].mxu0 }
 0x22d   :  { %v1756_v42 = vand.u32 2147483647, %v1751_v37  ;;  %v1761_v44 = vsub.f32 %v331_v33, %v420_v40  ;;  %v1117_v45 = vpop.f32.mrb[11].mxu1  ;;  %v1764_v46 = vand.u32 2147483647, %v1753_v41  ;;  %v1157_v47 = vpop.f32.mrb[7].mxu0 }
 0x22e   :  { %vm564_vm6 = vcmp.lt.f32.partialorder %v1751_v37, 0.0  ;;  %vm571_vm9 = vcmp.lt.f32.partialorder %v1753_v41, 0.0 }
 0x22f   :  { %v512_v48 = vmax.f32 %v1756_v42, %v1759_v43  ;;  %v514_v49 = vmin.f32 %v1756_v42, %v1759_v43  ;;  %vm558_vm2 = vcmp.gt.f32.partialorder %v1759_v43, %v1756_v42  ;;  %v1773_v50 = vand.u32 2147483647, %v1761_v44 }
 0x230   :  { %vm565_vm7 = vcmp.lt.f32.partialorder %v1761_v44, 0.0 }
 0x231   :  { %v516_v51 = vmax.f32 %v512_v48, 1e-30  ;;  %v513_v52 = vmax.f32 %v1773_v50, %v1764_v46  ;;  %v515_v53 = vmin.f32 %v1773_v50, %v1764_v46  ;;  %vm559_vm3 = vcmp.gt.f32.partialorder %v1764_v46, %v1773_v50 }
 0x232   :  { %v618_v54 = vpop.f32.mrb[8].mxu0  ;;  %v659_v55 = vpop.f32.mrb[12].mxu1 }
 0x233   :  { %1290 = vrcp.f32 %v516_v51  ;;  %v517_v56 = vmax.f32 %v513_v52, 1e-30  ;;  %v1162_v57 = vpop.f32.mrb[9].mxu0  ;;  %v1168_v58 = vpop.f32.mrb[13].mxu1 }
 0x234   :  { %v621_v59 = vpop.f32.mrb[10].mxu0  ;;  %v662_v60 = vpop.f32.mrb[14].mxu1 }
 0x235   :  { %1292 = vrcp.f32 %v517_v56  ;;  %v1781_v61 = vpack.c.bf16 %v621_v59, %v618_v54  ;;  %v667_v62 = vpack.c.bf16 %v662_v60, %v659_v55  ;;  %v1163_v63 = vpop.f32.mrb[11].mxu0  ;;  %v1169_v1 = vpop.f32.mrb[15].mxu1 }
 0x237   :  { %1187 = vmatmul.mubr.bf16.vlgmr.msra.gmra.mrb[16].mxu1 %v1781_v61  ;;  %1227 = vmatmul.mubr.bf16.vlgmr.msra.gmra.mrb[12].mxu0 %v667_v62 }
 0x238   :  { %1191 = vmatpush3.bf16.msra.mxu1 %v1651_v18  ;;  %1231 = vmatpush3.bf16.msra.mxu0 %v1651_v18 }
 0x239   :  { %1192 = vmatprep.subr.bf16.mxu1 %v1453_v0  ;;  %1232 = vmatprep.subr.bf16.mxu0 %v1453_v0 }
 0x23a   :  { %1206 = vmatprep.mubr.msk.bf16.mxu1 %vm1454_vm0, %v1453_v0  ;;  %1246 = vmatprep.mubr.msk.bf16.mxu0 %vm1454_vm0, %v1453_v0 }
 0x23c   :  { %1193 = vmatpush3.bf16.msra.mxu1 %v1655_v23  ;;  %1233 = vmatpush3.bf16.msra.mxu0 %v1655_v23 }
 0x23d   :  { %v1291_v2 = vpop.eup %1290  ;;  %1194 = vmatprep.subr.bf16.mxu1 %v1453_v0  ;;  %1234 = vmatprep.subr.bf16.mxu0 %v1453_v0 }
 0x23e   :  { %v520_v3 = vmul.f32 %v1291_v2, %v514_v49 }
 0x23f   :  { %v1293_v4 = vpop.eup %1292 }
 0x240   :  { %v526_v5 = vadd.f32 1.0, %v520_v3  ;;  %v521_v6 = vmul.f32 %v1293_v4, %v515_v53  ;;  %1195 = vmatpush3.bf16.msra.mxu1 %v1665_v24  ;;  %1235 = vmatpush3.bf16.msra.mxu0 %v1665_v24  ;;  %v971_v8 = vadd.f32 -1.0, %v520_v3  ;;  %vm522_vm4 = vcmp.gt.f32.partialorder %v520_v3, 0.41421357 }
 0x241   :  { %1196 = vmatprep.subr.bf16.mxu1 %v1453_v0  ;;  %1236 = vmatprep.subr.bf16.mxu0 %v1453_v0 }
 0x242   :  { %1294 = vrcp.f32 %v526_v5  ;;  %v527_v7 = vadd.f32 1.0, %v521_v6  ;;  %v972_v11 = vadd.f32 -1.0, %v521_v6  ;;  %vm523_vm5 = vcmp.gt.f32.partialorder %v521_v6, 0.41421357 }
 0x243   :  { %v535_v38 = vsel %vm523_vm5, 0.7853982, %v1453_v0 }
 0x244   :  { %1296 = vrcp.f32 %v527_v7  ;;  %1197 = vmatpush3.bf16.msra.mxu1 %v1671_v25  ;;  %1237 = vmatpush3.bf16.msra.mxu0 %v1671_v25 }
 0x245   :  { %1198 = vmatprep.subr.bf16.mxu1 %v1453_v0  ;;  %1238 = vmatprep.subr.bf16.mxu0 %v1453_v0 }
 0x248   :  { %1199 = vmatpush3.bf16.msra.mxu1 %v1677_v26  ;;  %1239 = vmatpush3.bf16.msra.mxu0 %v1677_v26 }
 0x249   :  { %1200 = vmatprep.subr.bf16.mxu1 %v1453_v0  ;;  %1240 = vmatprep.subr.bf16.mxu0 %v1453_v0 }
 0x24c   :  { %v1295_v9 = vpop.eup %1294  ;;  %1201 = vmatpush3.bf16.msra.mxu1 %v1683_v27  ;;  %1241 = vmatpush3.bf16.msra.mxu0 %v1683_v27 }
 0x24d   :  { %v530_v10 = vmul.f32 %v1295_v9, %v971_v8  ;;  %1202 = vmatprep.subr.bf16.mxu1 %v1453_v0  ;;  %1242 = vmatprep.subr.bf16.mxu0 %v1453_v0 }
 0x24e   :  { %v1297_v12 = vpop.eup %1296 }
 0x24f   :  { %v531_v13 = vmul.f32 %v1297_v12, %v972_v11  ;;  %v532_v14 = vsel %vm522_vm4, %v530_v10, %v520_v3 }
 0x250   :  { %1203 = vmatpush3.bf16.msra.mxu1 %v1689_v28  ;;  %1243 = vmatpush3.bf16.msra.mxu0 %v1689_v28  ;;  %v536_v15 = vmul.f32 %v532_v14, %v532_v14 }
 0x251   :  { %1204 = vmatprep.subr.bf16.mxu1 %v1453_v0  ;;  %1244 = vmatprep.subr.bf16.mxu0 %v1453_v0  ;;  %v533_v16 = vsel %vm523_vm5, %v531_v13, %v521_v6 }
 0x252   :  { %v537_v17 = vmul.f32 %v533_v16, %v533_v16  ;;  %v538_v18 = vmul.f32 0.080537446, %v536_v15 }
 0x254   :  { %1205 = vmatpush3.bf16.msra.mxu1 %v1695_v29  ;;  %1245 = vmatpush3.bf16.msra.mxu0 %v1695_v29  ;;  %v539_v19 = vmul.f32 0.080537446, %v537_v17  ;;  %v973_v20 = vadd.f32 -0.13877685, %v538_v18  ;;  %v534_v29 = vsel %vm522_vm4, 0.7853982, %v1453_v0 }
 0x256   :  { %v974_v21 = vadd.f32 -0.13877685, %v539_v19  ;;  %v542_v22 = vmul.f32 %v973_v20, %v536_v15 }
 0x257   :  { %1207 = vmatmul.mubr.bf16.vlgmr.msra.gmra.mrb[20].mxu1 %v667_v62  ;;  %1247 = vmatmul.mubr.bf16.vlgmr.msra.gmra.mrb[12].mxu0 %v1781_v61 }
 0x258   :  { %v543_v23 = vmul.f32 %v974_v21, %v537_v17  ;;  %v544_v24 = vadd.f32 0.19977711, %v542_v22 }
 0x25a   :  { %v545_v25 = vadd.f32 0.19977711, %v543_v23  ;;  %v546_v26 = vmul.f32 %v544_v24, %v536_v15 }
 0x25c   :  { %v547_v27 = vmul.f32 %v545_v25, %v537_v17  ;;  %v975_v28 = vadd.f32 -0.3333295, %v546_v26 }
 0x25e   :  { %v976_v30 = vadd.f32 -0.3333295, %v547_v27  ;;  %v550_v31 = vmul.f32 %v975_v28, %v536_v15 }
 0x260   :  { %v551_v32 = vmul.f32 %v976_v30, %v537_v17  ;;  %v552_v33 = vmul.f32 %v550_v31, %v532_v14 }
 0x262   :  { %v553_v34 = vmul.f32 %v551_v32, %v533_v16  ;;  %v554_v35 = vadd.f32 %v552_v33, %v534_v29 }
 0x264   :  { %v555_v39 = vadd.f32 %v553_v34, %v535_v38  ;;  %v556_v40 = vadd.f32 %v554_v35, %v532_v14 }
 0x266   :  { %v557_v45 = vadd.f32 %v555_v39, %v533_v16  ;;  %v560_v47 = vsub.f32 1.5707964, %v556_v40 }
 0x268   :  { %v561_v48 = vsub.f32 1.5707964, %v557_v45  ;;  %v562_v49 = vsel %vm558_vm2, %v560_v47, %v556_v40  ;;  %vm97_vm2 = vcmask 0  }
 0x269   :  { %v566_v51 = vsub.f32 3.1415927, %v562_v49  ;;  %98 = vst.msk [vmem:[#allocation12] sm:$0x1] %vm97_vm2, %v1453_v0 }
 0x26a   :  { %v563_v52 = vsel %vm559_vm3, %v561_v48, %v557_v45 }
 0x26b   :  { %v567_v53 = vsub.f32 3.1415927, %v563_v52  ;;  %v568_v54 = vsel %vm564_vm6, %v566_v51, %v562_v49 }
 0x26c   :  { %v572_v55 = vsub.f32 0.0, %v568_v54 }
 0x26d   :  { %v569_v56 = vsel %vm565_vm7, %v567_v53, %v563_v52 }
 0x26e   :  { %v573_v57 = vsub.f32 0.0, %v569_v56  ;;  %v1834_v58 = vsel %vm570_vm8, %v572_v55, %v568_v54 }
 0x270   :  { %v1837_v42 = vsel %vm571_vm9, %v573_v57, %v569_v56 }
 0x30a   :  { %v702_v37 = vpop.f32.mrb[16].mxu1 }
 0x30b   :  { %v1188_v43 = vpop.f32.mrb[17].mxu1 }
 0x30c   :  { %v705_v59 = vpop.f32.mrb[18].mxu1 }
 0x30d   :  { %v1189_v46 = vpop.f32.mrb[19].mxu1 }
 0x32a   :  { %v743_v50 = vpop.f32.mrb[20].mxu1  ;;  %v1839_v60 = vpop.f32.mrb[12].mxu0 }
 0x32b   :  { %v1841_v61 = vsub.f32 %v702_v37, %v743_v50  ;;  %v1208_v44 = vpop.f32.mrb[21].mxu1  ;;  %v1248_v62 = vpop.f32.mrb[13].mxu0  ;;  %v834_v41 = vand.u32 2147483647, %v1839_v60  ;;  %vm896_vm0 = vcmp.lt.f32.partialorder %v1839_v60, 0.0 }
 0x32c   :  { %v746_v36 = vpop.f32.mrb[22].mxu1  ;;  %v1843_v63 = vpop.f32.mrb[14].mxu0 }
 0x32d   :  { %v1846_v1 = vand.u32 2147483647, %v1841_v61  ;;  %v1849_v2 = vsub.f32 %v705_v59, %v746_v36  ;;  %v1209_v3 = vpop.f32.mrb[23].mxu1  ;;  %v835_v4 = vand.u32 2147483647, %v1843_v63  ;;  %v1249_v5 = vpop.f32.mrb[15].mxu0 }
 0x32e   :  { %vm890_vm14 = vcmp.lt.f32.partialorder %v1841_v61, 0.0  ;;  %vm897_vm1 = vcmp.lt.f32.partialorder %v1843_v63, 0.0 }
 0x32f   :  { %v838_v6 = vmax.f32 %v1846_v1, %v834_v41  ;;  %v840_v7 = vmin.f32 %v1846_v1, %v834_v41  ;;  %vm884_vm10 = vcmp.gt.f32.partialorder %v834_v41, %v1846_v1  ;;  %v837_v8 = vand.u32 2147483647, %v1849_v2 }
 0x330   :  { %vm891_vm15 = vcmp.lt.f32.partialorder %v1849_v2, 0.0 }
 0x331   :  { %v842_v9 = vmax.f32 %v838_v6, 1e-30  ;;  %v839_v10 = vmax.f32 %v837_v8, %v835_v4  ;;  %v841_v11 = vmin.f32 %v837_v8, %v835_v4  ;;  %vm885_vm11 = vcmp.gt.f32.partialorder %v835_v4, %v837_v8 }
 0x333   :  { %1298 = vrcp.f32 %v842_v9  ;;  %v843_v12 = vmax.f32 %v839_v10, 1e-30 }
 0x335   :  { %1300 = vrcp.f32 %v843_v12 }
 0x33d   :  { %v1299_v13 = vpop.eup %1298 }
 0x33e   :  { %v846_v14 = vmul.f32 %v1299_v13, %v840_v7 }
 0x33f   :  { %v1301_v15 = vpop.eup %1300 }
 0x340   :  { %v852_v16 = vadd.f32 1.0, %v846_v14  ;;  %v847_v17 = vmul.f32 %v1301_v15, %v841_v11  ;;  %v980_v19 = vadd.f32 -1.0, %v846_v14  ;;  %vm848_vm12 = vcmp.gt.f32.partialorder %v846_v14, 0.41421357 }
 0x341   :  { %v860_v52 = vsel %vm848_vm12, 0.7853982, %v1453_v0 }
 0x342   :  { %1302 = vrcp.f32 %v852_v16  ;;  %v853_v18 = vadd.f32 1.0, %v847_v17  ;;  %v981_v22 = vadd.f32 -1.0, %v847_v17  ;;  %vm849_vm13 = vcmp.gt.f32.partialorder %v847_v17, 0.41421357 }
 0x343   :  { %v861_v55 = vsel %vm849_vm13, 0.7853982, %v1453_v0 }
 0x344   :  { %1304 = vrcp.f32 %v853_v18 }
 0x34c   :  { %v1303_v20 = vpop.eup %1302 }
 0x34d   :  { %v856_v21 = vmul.f32 %v1303_v20, %v980_v19 }
 0x34e   :  { %v1305_v23 = vpop.eup %1304 }
 0x34f   :  { %v857_v24 = vmul.f32 %v1305_v23, %v981_v22  ;;  %v858_v25 = vsel %vm848_vm12, %v856_v21, %v846_v14 }
 0x350   :  { %v862_v26 = vmul.f32 %v858_v25, %v858_v25 }
 0x351   :  { %v859_v27 = vsel %vm849_vm13, %v857_v24, %v847_v17 }
 0x352   :  { %v863_v28 = vmul.f32 %v859_v27, %v859_v27  ;;  %v864_v30 = vmul.f32 0.080537446, %v862_v26 }
 0x354   :  { %v865_v31 = vmul.f32 0.080537446, %v863_v28  ;;  %v982_v32 = vadd.f32 -0.13877685, %v864_v30 }
 0x356   :  { %v983_v33 = vadd.f32 -0.13877685, %v865_v31  ;;  %v868_v29 = vmul.f32 %v982_v32, %v862_v26 }
 0x358   :  { %v869_v34 = vmul.f32 %v983_v33, %v863_v28  ;;  %v870_v35 = vadd.f32 0.19977711, %v868_v29 }
 0x35a   :  { %v871_v38 = vadd.f32 0.19977711, %v869_v34  ;;  %v872_v39 = vmul.f32 %v870_v35, %v862_v26 }
 0x35c   :  { %v873_v40 = vmul.f32 %v871_v38, %v863_v28  ;;  %v984_v45 = vadd.f32 -0.3333295, %v872_v39 }
 0x35e   :  { %v985_v47 = vadd.f32 -0.3333295, %v873_v40  ;;  %v876_v48 = vmul.f32 %v984_v45, %v862_v26 }
 0x360   :  { %v877_v49 = vmul.f32 %v985_v47, %v863_v28  ;;  %v878_v51 = vmul.f32 %v876_v48, %v858_v25 }
 0x362   :  { %v879_v53 = vmul.f32 %v877_v49, %v859_v27  ;;  %v880_v54 = vadd.f32 %v878_v51, %v860_v52 }
 0x364   :  { %v881_v56 = vadd.f32 %v879_v53, %v861_v55  ;;  %v882_v57 = vadd.f32 %v880_v54, %v858_v25 }
 0x366   :  { %v883_v37 = vadd.f32 %v881_v56, %v859_v27  ;;  %v886_v43 = vsub.f32 1.5707964, %v882_v57 }
 0x368   :  { %v887_v59 = vsub.f32 1.5707964, %v883_v37  ;;  %v888_v46 = vsel %vm884_vm10, %v886_v43, %v882_v57 }
 0x369   :  { %v892_v50 = vsub.f32 3.1415927, %v888_v46 }
 0x36a   :  { %v889_v44 = vsel %vm885_vm11, %v887_v59, %v883_v37 }
 0x36b   :  { %v893_v62 = vsub.f32 3.1415927, %v889_v44  ;;  %v894_v36 = vsel %vm890_vm14, %v892_v50, %v888_v46 }
 0x36c   :  { %v898_v3 = vsub.f32 0.0, %v894_v36 }
 0x36d   :  { %v895_v5 = vsel %vm891_vm15, %v893_v62, %v889_v44 }
 0x36e   :  { %v899_v6 = vsub.f32 0.0, %v895_v5  ;;  %v900_v7 = vsel %vm896_vm0, %v898_v3, %v894_v36 }
 0x36f   :  { %v904_v1 = vsub.f32 %v1834_v58, %v900_v7  ;;  %v915_v58 = vld [vmem:[#allocation12] sm:$0x1] }
 0x370   :  { %v901_v41 = vsel %vm897_vm1, %v899_v6, %v895_v5 }
 0x371   :  { %v905_v9 = vsub.f32 %v1837_v42, %v901_v41  ;;  %v906_v61 = vand.u32 2147483647, %v904_v1 }
 0x373   :  { %v907_v4 = vand.u32 2147483647, %v905_v9 }
 0x375   :  { %v918_v8 = vadd.f32 %v907_v4, %v906_v61 }
 0x377   :  { %919 = vadd.xlane.f32.xlu0 %v918_v8 }
 0x404   :  { %v920_v2 = vpop.xlane.xlu0 %919 }
 0x405   :  { %v921_v60 = vrot.slane %v920_v2, 4 }
 0x407   :  { %v922_v10 = vadd.f32 %v921_v60, %v920_v2 }
 0x409   :  { %v923_v11 = vrot.slane %v922_v10, 2 }
 0x40b   :  { %v924_v12 = vadd.f32 %v923_v11, %v922_v10 }
 0x40d   :  { %v925_v13 = vrot.slane %v924_v12, 1 }
 0x40f   :  { %v926_v63 = vadd.f32 %v925_v13, %v924_v12 }
 0x411   :  { %1258 = vpush %v926_v63 }
 0x442   :  { %s1259_s3 = spop %1258 }
 0x443   :  { %s928_s10 = smul.f32 0.00086805556, %s1259_s3 }
 0x445   :  { %v929_v42 = vstv %s928_s10 }
 0x446   :  { %v930_v14 = vadd.f32 %v929_v42, %v915_v58 }
 0x448   :  { %932 = vst.msk [vmem:[#allocation12] sm:$0x1] %vm97_vm2, %v930_v14 }
 0x449   :  { %1427 = shalt.err (!%p1424_p2)
}
 0x44a   :  { %s1428_s15 = scalar_lea.hbm %s1892_s6, 16 }
 0x44b   :  { %p1429_p3 = scmp.ne.s32.totalorder %s1892_s6, %s1428_s15  ;;  %p1432_p4 = scmp.lt.u32.totalorder %s1428_s15, %s1892_s6 }
 0x44d   :  { %p1434_p5 = pnand %p1432_p4, %p1429_p3 }
 0x44f   :  { %1437 = shalt.err (!%p1434_p5)
}
 0x450   :  { %942 = dma.vmem_to_hbm [thread:$0]  %s940_s4, 16, %s1892_s6, [#allocation5]  }
 0x451   :  { %1444 = dma.done.wait [#allocation5], 16  }
 0x452   :  { %1445 = vsyncadd [#allocation5], 4294967280 }
 0x453   :  { %946 = vsyncpa [#allocation4], 1 }
 0x454   :  { %947 = vsyncpa [#allocation7], 1 }
 0x455   :  { %948 = vsyncpa [#allocation10], 1 }
 0x456   :  { %949 = vsyncpa [#allocation5], 1 }

</bundles_post_ra>
